<compile_context>
chip_gen: v6e
topology: v6e:2x2x1
jax: 0.10.0
libtpu: 0.0.40
codegen_flags: <defaults>
</compile_context>

<pallas_src>
import functools

import jax
import jax.numpy as jnp
from jax.experimental import pallas as pl
from jax.experimental.pallas import tpu as pltpu

_MIB = 1024 * 1024
_VMEM_LIMIT_BYTES = 32 * _MIB      # explicit scoped-VMEM request: safe on v5e/v6e/v7x
_SCOPED_VMEM_BUDGET = 26 * _MIB    # what tiling actually plans to use (headroom under limit)
_DEFAULT_BLOCK_BUDGET = 8 * _MIB   # target real bytes per input block
_PACKED_HW_MAX = 128               # small-HW threshold: packed MXU path


def _round_up(x, m):
    return (x + m - 1) // m * m


def _pick_tile(total, unit_bytes, block_budget):
    """Units (rows or 128-row groups) per grid step: multiple of 8, as large as the
    block budget allows, but capped so the row grid keeps >= 2 (>= 4 when there is
    enough work) steps for megacore splitting + DMA/compute overlap."""
    if total <= 8:
        return total                              # full extent: always layout-legal
    by_bytes = max(8, (block_budget // unit_bytes) // 8 * 8)
    want_steps = 4 if total >= 32 else 2
    by_split = _round_up(pl.cdiv(total, want_steps), 8)
    return max(8, min(by_bytes, by_split))


# ---------------------------------------------------------------------------
# Small H*W (<= 128): packed 128-rows-per-group reduction on the MXU.
# ---------------------------------------------------------------------------
def _packed_pool_kernel(x_ref, ones_ref, o_ref, *, inv_hw):
    # x_ref: (tg, 128*hw) -- 128 rows packed per group-row.
    # ones_ref: resident block-diagonal 0/1 matrix (128*hw, 128).
    # One MXU matmul reduces each packed row over its hw lanes -> lane-dense (tg, 128).
    s = jnp.dot(x_ref[...], ones_ref[...], preferred_element_type=jnp.float32)
    o_ref[...] = (s * inv_hw).astype(o_ref.dtype)


def _pool_small_hw(x2, rows, hw, out_dtype, block_budget):
    itemsize = x2.dtype.itemsize
    rows_pad = _round_up(rows, 128)
    if rows_pad != rows:
        x2 = jnp.pad(x2, ((0, rows_pad - rows), (0, 0)))
    groups = rows_pad // 128
    x3 = x2.reshape(groups, 128 * hw)             # metadata-only reshape

    # Block-diagonal 0/1 reduction matrix (built once, outside the kernel).
    q = jnp.arange(128 * hw, dtype=jnp.int32)[:, None]
    p = jnp.arange(128, dtype=jnp.int32)[None, :]
    ones = (q // hw == p).astype(x2.dtype)
    ones_bytes = 128 * hw * 128 * itemsize

    # Budget: 2x double-buffered input block + (up to) 2x the resident matrix.
    blk_budget = min(block_budget,
                     max(512 * 1024, (_SCOPED_VMEM_BUDGET - 2 * ones_bytes) // 2))
    unit = 128 * hw * itemsize                    # lane-dense bytes per group-row
    tg = _pick_tile(groups, unit, blk_budget)
    grid = (pl.cdiv(groups, tg),)

    out = pl.pallas_call(
        functools.partial(_packed_pool_kernel, inv_hw=1.0 / hw),
        out_shape=jax.ShapeDtypeStruct((groups, 128), out_dtype),
        grid=grid,
        in_specs=[
            pl.BlockSpec((tg, 128 * hw), lambda i: (i, 0)),
            pl.BlockSpec((128 * hw, 128), lambda i: (0, 0)),  # resident, fetched once/core
        ],
        out_specs=pl.BlockSpec((tg, 128), lambda i: (i, 0)),
        compiler_params=pltpu.CompilerParams(
            dimension_semantics=("parallel",),
            vmem_limit_bytes=_VMEM_LIMIT_BYTES,
        ),
        cost_estimate=pl.CostEstimate(
            flops=2 * groups * 128 * hw * 128,
            transcendentals=0,
            bytes_accessed=(x3.size * itemsize + ones.size * itemsize
                            + groups * 128 * jnp.dtype(out_dtype).itemsize),
        ),
    )(x3, ones)
    return out.reshape(rows_pad)[:rows]           # drop rows added by 128-padding


# ---------------------------------------------------------------------------
# Large H*W (> 128): row-tiled lane reduce with optional hw chunking.
# ---------------------------------------------------------------------------
def _row_pool_kernel(x_ref, o_ref, acc_ref, *, inv_hw, hw, thw, masked):
    # x_ref: (tm, thw) chunk of the (rows, hw) slab; acc_ref: (tm, 1) f32 scratch.
    k = pl.program_id(1)

    @pl.when(k == 0)
    def _init():
        acc_ref[...] = jnp.zeros_like(acc_ref)

    x = x_ref[...]
    if masked:  # ragged hw tail: zero out-of-range lanes before accumulating
        lane = jax.lax.broadcasted_iota(jnp.int32, x.shape, 1) + k * thw
        x = jnp.where(lane < hw, x, jnp.zeros_like(x))
    # Fused widening accumulation: no materialized f32 copy of the whole tile.
    acc_ref[...] += jnp.sum(x, axis=1, dtype=jnp.float32, keepdims=True)

    @pl.when(k == pl.num_programs(1) - 1)
    def _finalize():
        o_ref[...] = (acc_ref[...] * inv_hw).astype(o_ref.dtype)


def _pool_large_hw(x2, rows, hw, out_dtype, block_budget):
    itemsize = x2.dtype.itemsize
    unit = _round_up(hw, 128) * itemsize          # lane-padded bytes per row
    tm = _pick_tile(rows, unit, block_budget)
    if tm * unit <= block_budget:
        thw, masked = hw, False                   # whole row fits: single hw chunk
    else:                                         # huge H*W: chunk the reduction axis
        thw = max(128, (block_budget // (tm * itemsize)) // 128 * 128)
        masked = (hw % thw) != 0
    n_hw = pl.cdiv(hw, thw)
    grid = (pl.cdiv(rows, tm), n_hw)              # reduction (hw) axis last

    out = pl.pallas_call(
        functools.partial(_row_pool_kernel, inv_hw=1.0 / hw, hw=hw, thw=thw, masked=masked),
        out_shape=jax.ShapeDtypeStruct((rows, 1), out_dtype),
        grid=grid,
        in_specs=[pl.BlockSpec((tm, thw), lambda i, k: (i, k))],
        out_specs=pl.BlockSpec((tm, 1), lambda i, k: (i, 0)),
        scratch_shapes=[pltpu.VMEM((tm, 1), jnp.float32)],
        compiler_params=pltpu.CompilerParams(
            dimension_semantics=("parallel", "arbitrary"),
            vmem_limit_bytes=_VMEM_LIMIT_BYTES,
        ),
        cost_estimate=pl.CostEstimate(
            flops=rows * hw,
            transcendentals=0,
            bytes_accessed=rows * hw * itemsize + rows * jnp.dtype(out_dtype).itemsize,
        ),
    )(x2)
    return out


def global_avg_pool2d(x, *, block_budget_bytes=None):
    """Pallas TPU implementation of F.avg_pool2d(x, kernel_size=x.shape[2:])."""
    n, c, h, w = x.shape
    rows, hw = n * c, h * w
    budget = _DEFAULT_BLOCK_BUDGET if block_budget_bytes is None else int(block_budget_bytes)
    x2 = x.reshape(rows, hw)                      # metadata-only for contiguous NCHW
    if hw <= _PACKED_HW_MAX:
        out = _pool_small_hw(x2, rows, hw, x.dtype, budget)
    else:
        out = _pool_large_hw(x2, rows, hw, x.dtype, budget)
    return out.reshape(n, c, 1, 1)


def _check(x, atol=1e-5, rtol=1e-5, **kw):
    out = jax.block_until_ready(global_avg_pool2d(x, **kw))
    ref = jnp.mean(x.astype(jnp.float32), axis=(2, 3), keepdims=True).astype(x.dtype)
    assert out.shape == ref.shape, (out.shape, ref.shape)
    assert out.dtype == x.dtype, (out.dtype, x.dtype)
    assert jnp.allclose(out.astype(jnp.float32), ref.astype(jnp.float32),
                        atol=atol, rtol=rtol), "mismatch vs reference"
    return out


if __name__ == "__main__":
    key = jax.random.PRNGKey(0)
    k0, k1, k2, k3, k4 = jax.random.split(key, 5)

    # Small NCHW input consistent with a conv feature map (row path, single block).
    x = jax.random.normal(k0, (2, 4, 16, 16), dtype=jnp.float32)
    out = _check(x)
    assert out.shape == (2, 4, 1, 1), out.shape

    # DenseNet-style final feature map (7x7) -> packed MXU path, multi-tile grid.
    _check(jax.random.normal(k1, (2, 640, 7, 7), dtype=jnp.float32))

    # Packed path with N*C not a multiple of 128 (exercises the row padding).
    _check(jax.random.normal(k2, (3, 100, 7, 7), dtype=jnp.float32))

    # bf16 input: fused widening f32 accumulation, bf16 output.
    _check(jax.random.normal(k3, (2, 64, 14, 14), dtype=jnp.bfloat16), atol=2e-2, rtol=2e-2)

    # Large, non-128-multiple H*W with a deliberately small block budget to force
    # the hw-chunked ("arbitrary" axis) accumulator path incl. ragged-tail masking.
    _check(jax.random.normal(k4, (2, 8, 95, 95), dtype=jnp.float32),
           block_budget_bytes=256 * 1024)

    print("KERNEL_OK")
</pallas_src>

<mosaic_0001>
module attributes {stable_mosaic.version = 11 : i64} {
  func.func @_row_pool_kernel(%arg0: i32, %arg1: i32, %arg2: memref<8x256xf32, #tpu.memory_space<vmem>>, %arg3: memref<8x1xf32, #tpu.memory_space<vmem>>, %arg4: memref<8x1xf32, #tpu.memory_space<vmem>>) attributes {dimension_semantics = [#tpu.dimension_semantics<parallel>, #tpu.dimension_semantics<arbitrary>], iteration_bounds = array<i64: 1, 1>, scalar_prefetch = 0 : i64, scratch_operands = 1 : i64, tpu.core_type = #tpu.core_type<tc>, window_params = [{transform_indices = @transform_0, window_bounds = array<i64: 8, 256>}, {transform_indices = @transform_1, window_bounds = array<i64: 8, 1>}]} {
    %c0_i32 = arith.constant 0 : i32
    %0 = arith.cmpi eq, %arg1, %c0_i32 : i32
    %1 = arith.extui %0 : i1 to i32
    %c0_i32_0 = arith.constant 0 : i32
    %2 = arith.cmpi ne, %1, %c0_i32_0 : i32
    scf.if %2 {
      %cst_8 = arith.constant 0.000000e+00 : f32
      %12 = vector.broadcast %cst_8 : f32 to vector<8x1xf32>
      %c0_9 = arith.constant 0 : index
      %c0_10 = arith.constant 0 : index
      %13 = vector.load %arg4[%c0_9, %c0_10] : memref<8x1xf32, #tpu.memory_space<vmem>>, vector<8x1xf32>
      tpu.vector_store %arg4[%c0_9, %c0_10], %12 {strides = array<i32>} : memref<8x1xf32, #tpu.memory_space<vmem>>, vector<8x1xf32>,
    } else {
    }
    %c0 = arith.constant 0 : index
    %c0_1 = arith.constant 0 : index
    %3 = vector.load %arg2[%c0, %c0_1] : memref<8x256xf32, #tpu.memory_space<vmem>>, vector<8x256xf32>
    %c0_2 = arith.constant 0 : index
    %c0_3 = arith.constant 0 : index
    %4 = vector.load %arg4[%c0_2, %c0_3] : memref<8x1xf32, #tpu.memory_space<vmem>>, vector<8x1xf32>
    %cst = arith.constant dense<0.000000e+00> : vector<8xf32>
    %5 = vector.multi_reduction <add>, %3, %cst [1] : vector<8x256xf32> to vector<8xf32>
    %6 = vector.shape_cast %5 : vector<8xf32> to vector<8x1xf32>
    %7 = arith.addf %4, %6 : vector<8x1xf32>
    %c0_4 = arith.constant 0 : index
    %c0_5 = arith.constant 0 : index
    %8 = vector.load %arg4[%c0_4, %c0_5] : memref<8x1xf32, #tpu.memory_space<vmem>>, vector<8x1xf32>
    tpu.vector_store %arg4[%c0_4, %c0_5], %7 {strides = array<i32>} : memref<8x1xf32, #tpu.memory_space<vmem>>, vector<8x1xf32>,
    %c0_i32_6 = arith.constant 0 : i32
    %9 = arith.cmpi eq, %arg1, %c0_i32_6 : i32
    %10 = arith.extui %9 : i1 to i32
    %c0_i32_7 = arith.constant 0 : i32
    %11 = arith.cmpi ne, %10, %c0_i32_7 : i32
    scf.if %11 {
      %c0_8 = arith.constant 0 : index
      %c0_9 = arith.constant 0 : index
      %12 = vector.load %arg4[%c0_8, %c0_9] : memref<8x1xf32, #tpu.memory_space<vmem>>, vector<8x1xf32>
      %cst_10 = arith.constant 3.906250e-03 : f32
      %13 = vector.broadcast %cst_10 : f32 to vector<8x1xf32>
      %14 = arith.mulf %12, %13 : vector<8x1xf32>
      %c0_11 = arith.constant 0 : index
      %c0_12 = arith.constant 0 : index
      %15 = vector.load %arg3[%c0_11, %c0_12] : memref<8x1xf32, #tpu.memory_space<vmem>>, vector<8x1xf32>
      tpu.vector_store %arg3[%c0_11, %c0_12], %14 {strides = array<i32>} : memref<8x1xf32, #tpu.memory_space<vmem>>, vector<8x1xf32>,
    } else {
    }
    return
  }
  func.func @transform_0(%arg0: i32, %arg1: i32) -> (i32, i32) {
    %c0_i32 = arith.constant 0 : i32
    return %arg0, %arg1 : i32, i32
  }
  func.func @transform_1(%arg0: i32, %arg1: i32) -> (i32, i32) {
    %c0_i32 = arith.constant 0 : i32
    %c0_i32_0 = arith.constant 0 : i32
    return %arg0, %c0_i32 : i32, i32
  }
}

</mosaic_0001>

<bundles_post_ra>
// kernel: tpu_custom_call.1
= control target key start
LH: loop header
LB: loop body
LE: loop exit
PB: predicated region body
PF: predicated region fallthrough
CT: control target
= control target key end

     0   :  { %6 = vsyncpa [#allocation4], 0  ;;  %s70_s6 = smov [#allocation3]   ;;  %s88_s0 = inlined_call_operand.hbm [shape: f32[8,256], index: 0, kind: input, shape index: {}]   ;;  %s89_s1 = inlined_call_operand.vmem [shape: f32[8,1], index: 1, kind: output, shape index: {}]  }
   0x1   :  { %s13_s7 = sshll.u32 %s70_s6, 4  ;;  %s14_s7 = int_to_ptr.vmem [resolvable:$true] %s13_s7 }
   0x2   :  { %s56_s8 = scalar_lea.vmem %s14_s7, 256  ;;  %p61_p1 = scmp.lt.s32.totalorder %s14_s7, %s14_s7 }
   0x3   :  { %p57_p0 = scmp.ne.s32.totalorder %s14_s7, %s56_s8  ;;  %p62_p2 = scmp.lt.s32.totalorder %s56_s8, %s56_s8 }
   0x5   :  { %p63_p3 = por %p62_p2, %p61_p1 }
   0x7   :  { %p64_p4 = pnand %p63_p3, %p57_p0 }
   0x9   :  { %67 = shalt.err (!%p64_p4)
}
   0xa   :  { %16 = dma.hbm_to_vmem [thread:$0]  %s88_s0, 256, %s14_s7, [#allocation4]  }
   0xb   :  { %68 = dma.done.wait [#allocation4], 256  }
   0xc   :  { %69 = vsyncadd [#allocation4], 4294967040  ;;  %vm24_vm0 = vcmask 7168   ;;  %v71_v0 = vmov 0.0   ;;  %v26_v1 = vld [vmem:[#allocation3] sm:$0xff]  ;;  %v27_v2 = vld [vmem:[#allocation3 + $0x8] sm:$0xff] }
   0xd   :  { %25 = vst.msk [vmem:[#allocation2] sm:$0xff] %vm24_vm0, %v71_v0  ;;  %v29_v3 = vadd.f32 %v27_v2, %v26_v1 }
   0xf   :  { %30 = vadd.xlane.f32.xlu0 %v29_v3 }
  0x14   :  { %v28_v4 = vld [vmem:[#allocation2] sm:$0xff] }
  0x98   :  { %v31_v5 = vpop.xlane.xlu0 %30 }
  0x99   :  { %v32_v6 = vadd.f32 %v31_v5, %v28_v4 }
  0x9b   :  { %34 = vst.msk [vmem:[#allocation2] sm:$0xff] %vm24_vm0, %v32_v6 }
  0xa2   :  { %v38_v7 = vld [vmem:[#allocation2] sm:$0xff] }
  0xa3   :  { %v39_v8 = vmul.f32 0.00390625, %v38_v7 }
  0xa5   :  { %40 = vst.msk [vmem:[%s89_s1] sm:$0xff] %vm24_vm0, %v39_v8 }
  0xa6   :  { %45 = vsyncpa [#allocation4], 1 }

</bundles_post_ra>
